<compile_context>
chip_gen: v6e
topology: v6e:2x2x1
jax: 0.10.0
libtpu: 0.0.40
codegen_flags: <defaults>
</compile_context>

<pallas_src>
import functools

import jax
import jax.numpy as jnp
from jax.experimental import pallas as pl
from jax.experimental.pallas import tpu as pltpu


def _round_up(a: int, b: int) -> int:
    return (a + b - 1) // b * b


def _vmem_capacity_bytes() -> int:
    """Physical VMEM of the current chip; conservative 64 MiB (v7x) fallback."""
    try:
        return int(pltpu.get_tpu_info().vmem_capacity_bytes)
    except Exception:
        return 64 << 20


def _mlp_kernel(x_ref, wgu_ref, wd_ref, o_ref, acc_ref, *, ti):
    # x_ref:   (tm, H)      bf16 token tile (resident across the I axis)
    # wgu_ref: (H, 2*ti)    fused [gate | up] weight tile for I-slice j
    # wd_ref:  (ti, H)      down-projection weight tile for I-slice j
    # o_ref:   (tm, H)      output tile (revisited across the I axis)
    # acc_ref: (tm, H) f32  accumulator scratch
    j = pl.program_id(1)

    @pl.when(j == 0)
    def _():
        acc_ref[...] = jnp.zeros_like(acc_ref)

    # Single wide-N matmul for gate and up projections (bf16 MXU, f32 accumulate).
    gu = jnp.dot(x_ref[...], wgu_ref[...], preferred_element_type=jnp.float32)
    gate = gu[:, :ti]          # ti is a multiple of 128 -> lane-tile aligned slice
    up = gu[:, ti:]

    # SiLU(gate) * up, kept in f32 on the VPU/EUP.
    act = gate * jax.nn.sigmoid(gate) * up

    acc_ref[...] += jnp.dot(act.astype(wd_ref.dtype), wd_ref[...],
                            preferred_element_type=jnp.float32)

    @pl.when(j == pl.num_programs(1) - 1)
    def _():
        o_ref[...] = acc_ref[...].astype(o_ref.dtype)


def prepare_baichuan_mlp_weights(w_gate_up, w_down, *, ti=256, dtype=jnp.bfloat16):
    """One-time weight preparation (do this OUTSIDE the per-token hot path).

    w_gate_up: [2*I, H]  PyTorch Linear layout [out, in]
    w_down:    [H, I]    PyTorch Linear layout [out, in]

    Returns:
      wgu: [H, n_i * 2 * ti]  per-I-tile interleaved [gate_tile | up_tile] blocks
      wd:  [I_pad, H]         transposed down-projection weight
    """
    assert ti % 128 == 0, "ti must be a multiple of 128 (lane-tile alignment)"
    two_i, H = w_gate_up.shape
    I = two_i // 2
    assert w_down.shape == (H, I)

    I_pad = _round_up(I, ti)
    wg = jnp.transpose(w_gate_up[:I, :])   # [H, I]
    wu = jnp.transpose(w_gate_up[I:, :])   # [H, I]
    wd = jnp.transpose(w_down)             # [I, H]
    if I_pad != I:
        wg = jnp.pad(wg, ((0, 0), (0, I_pad - I)))
        wu = jnp.pad(wu, ((0, 0), (0, I_pad - I)))
        wd = jnp.pad(wd, ((0, I_pad - I), (0, 0)))

    n = I_pad // ti
    # Interleave so block j's columns are [gate(j*ti:(j+1)*ti) | up(j*ti:(j+1)*ti)].
    wgu = jnp.stack([wg.reshape(H, n, ti), wu.reshape(H, n, ti)], axis=2)
    wgu = wgu.reshape(H, n * 2 * ti)
    return wgu.astype(dtype), wd.astype(dtype)


def _vmem_need_bytes(tm, ti, H, w_itemsize, out_itemsize):
    x_bytes = 2 * tm * H * w_itemsize            # x tile, double-buffered
    wgu_bytes = 2 * H * (2 * ti) * w_itemsize    # fused gate/up tile, double-buffered
    wd_bytes = 2 * ti * H * w_itemsize           # down tile, double-buffered
    out_bytes = 2 * tm * H * out_itemsize        # output tile, double-buffered
    acc_bytes = tm * H * 4                       # f32 accumulator scratch
    return x_bytes + wgu_bytes + wd_bytes + out_bytes + acc_bytes


def baichuan_mlp(x, wgu, wd, *, tm=512, ti=256):
    """x: [T, H]; wgu/wd: prepared by prepare_baichuan_mlp_weights with the same ti."""
    T, H = x.shape
    assert ti % 128 == 0, "ti must be a multiple of 128"
    assert wgu.shape[0] == H and wd.shape[1] == H
    assert wgu.shape[1] % (2 * ti) == 0
    n_i = wgu.shape[1] // (2 * ti)
    assert wd.shape[0] == n_i * ti

    compute_dtype = wgu.dtype
    out_dtype = x.dtype
    itemsize = jnp.dtype(compute_dtype).itemsize
    out_itemsize = jnp.dtype(out_dtype).itemsize

    # Token tile: multiple of 16 (native bf16 sublane packing), clamped for tiny
    # inputs, then shrunk until the working set fits the chip's physical VMEM.
    tm = max(16, _round_up(min(tm, _round_up(T, 16)), 16))
    vmem_cap = int(_vmem_capacity_bytes() * 0.9)   # headroom for Mosaic scratch
    while tm > 16 and _vmem_need_bytes(tm, ti, H, itemsize, out_itemsize) > vmem_cap:
        tm = max(16, _round_up(tm // 2, 16))
    vmem_need = _vmem_need_bytes(tm, ti, H, itemsize, out_itemsize)
    vmem_limit = min(max(int(vmem_need * 1.25), 16 << 20), vmem_cap)
    vmem_limit = max(vmem_limit, vmem_need)        # never below the working set

    T_pad = _round_up(T, tm)
    x_c = x.astype(compute_dtype)
    if T_pad != T:
        x_c = jnp.pad(x_c, ((0, T_pad - T), (0, 0)))

    n_token_tiles = T_pad // tm
    grid = (n_token_tiles, n_i)

    I_total = n_i * ti
    cost = pl.CostEstimate(
        flops=6 * T_pad * H * I_total,              # 4*T*H*I (gate+up) + 2*T*I*H (down)
        transcendentals=T_pad * I_total,            # sigmoid
        bytes_accessed=(x_c.size * itemsize
                        + (wgu.size + wd.size) * itemsize * n_token_tiles  # re-streamed
                        + T_pad * H * out_itemsize),
    )

    out = pl.pallas_call(
        functools.partial(_mlp_kernel, ti=ti),
        out_shape=jax.ShapeDtypeStruct((T_pad, H), out_dtype),
        grid=grid,
        in_specs=[
            pl.BlockSpec((tm, H), lambda i, j: (i, 0)),        # x tile (const over j)
            pl.BlockSpec((H, 2 * ti), lambda i, j: (0, j)),    # fused gate/up tile
            pl.BlockSpec((ti, H), lambda i, j: (j, 0)),        # down-proj tile
        ],
        out_specs=pl.BlockSpec((tm, H), lambda i, j: (i, 0)),
        scratch_shapes=[pltpu.VMEM((tm, H), jnp.float32)],
        compiler_params=pltpu.CompilerParams(
            dimension_semantics=("parallel", "arbitrary"),
            vmem_limit_bytes=vmem_limit),
        cost_estimate=cost,
    )(x_c, wgu, wd)

    return out[:T] if T_pad != T else out


def _reference_f32(x, w_gate_up, w_down):
    I = w_gate_up.shape[0] // 2
    gate_up = x @ w_gate_up.T
    gate, up = gate_up[:, :I], gate_up[:, I:]
    return (jax.nn.silu(gate) * up) @ w_down.T


def _reference_bf16(x, w_gate_up, w_down):
    # Mirrors the kernel arithmetic: bf16 operands, f32 accumulation, bf16 act.
    bf = jnp.bfloat16
    I = w_gate_up.shape[0] // 2
    xq = x.astype(bf).astype(jnp.float32)
    wg = w_gate_up[:I].astype(bf).astype(jnp.float32)
    wu = w_gate_up[I:].astype(bf).astype(jnp.float32)
    wd = w_down.astype(bf).astype(jnp.float32)
    gate = xq @ wg.T
    up = xq @ wu.T
    act = (jax.nn.silu(gate) * up).astype(bf).astype(jnp.float32)
    return act @ wd.T


if __name__ == "__main__":
    hidden_size = 256
    intermediate_size = 512
    num_tokens = 16

    key = jax.random.PRNGKey(0)
    kx, kg, kd = jax.random.split(key, 3)

    x = jax.random.normal(kx, (num_tokens, hidden_size), dtype=jnp.float32)
    # Deterministic synthetic parameters in PyTorch Linear layout [out, in].
    w_gate_up = jax.random.normal(
        kg, (2 * intermediate_size, hidden_size), dtype=jnp.float32) * 0.02
    w_down = jax.random.normal(
        kd, (hidden_size, intermediate_size), dtype=jnp.float32) * 0.02

    # ti=256 fills the MXU depth; with I=512 this still exercises the
    # multi-step intermediate-dim reduction (n_i = 2).
    ti = 256
    wgu, wd = prepare_baichuan_mlp_weights(w_gate_up, w_down, ti=ti)
    wgu, wd = jax.block_until_ready((wgu, wd))  # weight prep: once, off hot path

    out = baichuan_mlp(x, wgu, wd, tm=512, ti=ti)
    out = jax.block_until_ready(out)

    assert out.shape == (num_tokens, hidden_size)
    ref_q = _reference_bf16(x, w_gate_up, w_down)   # same-precision reference
    ref_f = _reference_f32(x, w_gate_up, w_down)    # full f32 reference (sanity)
    assert jnp.allclose(out, ref_q, atol=2e-2, rtol=2e-2), "mismatch vs bf16 reference"
    assert jnp.allclose(out, ref_f, atol=6e-2, rtol=6e-2), "mismatch vs f32 reference"

    print("KERNEL_OK")
</pallas_src>

<mosaic_0001>
module attributes {stable_mosaic.version = 11 : i64} {
  func.func @_mlp_kernel(%arg0: i32, %arg1: i32, %arg2: memref<16x256xbf16, #tpu.memory_space<vmem>>, %arg3: memref<256x512xbf16, #tpu.memory_space<vmem>>, %arg4: memref<256x256xbf16, #tpu.memory_space<vmem>>, %arg5: memref<16x256xf32, #tpu.memory_space<vmem>>, %arg6: memref<16x256xf32, #tpu.memory_space<vmem>>) attributes {dimension_semantics = [#tpu.dimension_semantics<parallel>, #tpu.dimension_semantics<arbitrary>], iteration_bounds = array<i64: 1, 2>, scalar_prefetch = 0 : i64, scratch_operands = 1 : i64, tpu.core_type = #tpu.core_type<tc>, window_params = [{transform_indices = @transform_0, window_bounds = array<i64: 16, 256>}, {transform_indices = @transform_1, window_bounds = array<i64: 256, 512>}, {transform_indices = @transform_2, window_bounds = array<i64: 256, 256>}, {transform_indices = @transform_3, window_bounds = array<i64: 16, 256>}]} {
    %c0_i32 = arith.constant 0 : i32
    %0 = arith.cmpi eq, %arg1, %c0_i32 : i32
    %1 = arith.extui %0 : i1 to i32
    %c0_i32_0 = arith.constant 0 : i32
    %2 = arith.cmpi ne, %1, %c0_i32_0 : i32
    scf.if %2 {
      %cst_13 = arith.constant 0.000000e+00 : f32
      %24 = vector.broadcast %cst_13 : f32 to vector<16x256xf32>
      %c0_14 = arith.constant 0 : index
      %c0_15 = arith.constant 0 : index
      %25 = vector.load %arg6[%c0_14, %c0_15] : memref<16x256xf32, #tpu.memory_space<vmem>>, vector<16x256xf32>
      tpu.vector_store %arg6[%c0_14, %c0_15], %24 {strides = array<i32>} : memref<16x256xf32, #tpu.memory_space<vmem>>, vector<16x256xf32>,
    } else {
    }
    %c0 = arith.constant 0 : index
    %c0_1 = arith.constant 0 : index
    %3 = vector.load %arg2[%c0, %c0_1] : memref<16x256xbf16, #tpu.memory_space<vmem>>, vector<16x256xbf16>
    %c0_2 = arith.constant 0 : index
    %c0_3 = arith.constant 0 : index
    %4 = vector.load %arg3[%c0_2, %c0_3] : memref<256x512xbf16, #tpu.memory_space<vmem>>, vector<256x512xbf16>
    %cst = arith.constant dense<0.000000e+00> : vector<16x512xf32>
    %5 = tpu.matmul %3, %4, %cst {dimension_numbers = #tpu.dot_dimension_numbers<[1], [0], [0], [1], [0, 0, 1, 1], [], []>} : vector<16x256xbf16>, vector<256x512xbf16>, vector<16x512xf32> -> vector<16x512xf32>
    %6 = vector.extract_strided_slice %5 {offsets = [0, 0], sizes = [16, 256], strides = [1, 1]} : vector<16x512xf32> to vector<16x256xf32>
    %7 = vector.extract_strided_slice %5 {offsets = [0, 256], sizes = [16, 256], strides = [1, 1]} : vector<16x512xf32> to vector<16x256xf32>
    %8 = arith.negf %6 : vector<16x256xf32>
    %9 = math.exp %8 : vector<16x256xf32>
    %cst_4 = arith.constant 1.000000e+00 : f32
    %10 = vector.broadcast %cst_4 : f32 to vector<16x256xf32>
    %11 = arith.addf %10, %9 : vector<16x256xf32>
    %12 = arith.divf %10, %11 : vector<16x256xf32>
    %13 = arith.mulf %6, %12 : vector<16x256xf32>
    %14 = arith.mulf %13, %7 : vector<16x256xf32>
    %c0_5 = arith.constant 0 : index
    %c0_6 = arith.constant 0 : index
    %15 = vector.load %arg6[%c0_5, %c0_6] : memref<16x256xf32, #tpu.memory_space<vmem>>, vector<16x256xf32>
    %16 = arith.truncf %14 : vector<16x256xf32> to vector<16x256xbf16>
    %c0_7 = arith.constant 0 : index
    %c0_8 = arith.constant 0 : index
    %17 = vector.load %arg4[%c0_7, %c0_8] : memref<256x256xbf16, #tpu.memory_space<vmem>>, vector<256x256xbf16>
    %cst_9 = arith.constant dense<0.000000e+00> : vector<16x256xf32>
    %18 = tpu.matmul %16, %17, %cst_9 {dimension_numbers = #tpu.dot_dimension_numbers<[1], [0], [0], [1], [0, 0, 1, 1], [], []>} : vector<16x256xbf16>, vector<256x256xbf16>, vector<16x256xf32> -> vector<16x256xf32>
    %19 = arith.addf %15, %18 : vector<16x256xf32>
    %c0_10 = arith.constant 0 : index
    %c0_11 = arith.constant 0 : index
    %20 = vector.load %arg6[%c0_10, %c0_11] : memref<16x256xf32, #tpu.memory_space<vmem>>, vector<16x256xf32>
    tpu.vector_store %arg6[%c0_10, %c0_11], %19 {strides = array<i32>} : memref<16x256xf32, #tpu.memory_space<vmem>>, vector<16x256xf32>,
    %c1_i32 = arith.constant 1 : i32
    %21 = arith.cmpi eq, %arg1, %c1_i32 : i32
    %22 = arith.extui %21 : i1 to i32
    %c0_i32_12 = arith.constant 0 : i32
    %23 = arith.cmpi ne, %22, %c0_i32_12 : i32
    scf.if %23 {
      %c0_13 = arith.constant 0 : index
      %c0_14 = arith.constant 0 : index
      %24 = vector.load %arg6[%c0_13, %c0_14] : memref<16x256xf32, #tpu.memory_space<vmem>>, vector<16x256xf32>
      %c0_15 = arith.constant 0 : index
      %c0_16 = arith.constant 0 : index
      %25 = vector.load %arg5[%c0_15, %c0_16] : memref<16x256xf32, #tpu.memory_space<vmem>>, vector<16x256xf32>
      tpu.vector_store %arg5[%c0_15, %c0_16], %24 {strides = array<i32>} : memref<16x256xf32, #tpu.memory_space<vmem>>, vector<16x256xf32>,
    } else {
    }
    return
  }
  func.func @transform_0(%arg0: i32, %arg1: i32) -> (i32, i32) {
    %c0_i32 = arith.constant 0 : i32
    %c0_i32_0 = arith.constant 0 : i32
    return %arg0, %c0_i32 : i32, i32
  }
  func.func @transform_1(%arg0: i32, %arg1: i32) -> (i32, i32) {
    %c0_i32 = arith.constant 0 : i32
    %c0_i32_0 = arith.constant 0 : i32
    return %c0_i32, %arg1 : i32, i32
  }
  func.func @transform_2(%arg0: i32, %arg1: i32) -> (i32, i32) {
    %c0_i32 = arith.constant 0 : i32
    %c0_i32_0 = arith.constant 0 : i32
    return %arg1, %c0_i32 : i32, i32
  }
  func.func @transform_3(%arg0: i32, %arg1: i32) -> (i32, i32) {
    %c0_i32 = arith.constant 0 : i32
    %c0_i32_0 = arith.constant 0 : i32
    return %arg0, %c0_i32 : i32, i32
  }
}

</mosaic_0001>

<bundles_post_ra>
// kernel: tpu_custom_call.1
= control target key start
LH: loop header
LB: loop body
LE: loop exit
PB: predicated region body
PF: predicated region fallthrough
CT: control target
= control target key end

     0   :  { %8 = vsyncpa [#allocation4], 0  ;;  %s1987_s0 = inlined_call_operand.hbm [shape: bf16[16,256], index: 0, kind: input, shape index: {}]   ;;  %s1988_s1 = inlined_call_operand.hbm [shape: bf16[256,1024], index: 1, kind: input, shape index: {}]   ;;  %s1989_s2 = inlined_call_operand.hbm [shape: bf16[512,256], index: 2, kind: input, shape index: {}]   ;;  %s1990_s3 = inlined_call_operand.hbm [shape: f32[16,256], index: 3, kind: output, shape index: {}]  }
   0x1   :  { %9 = vsyncpa [#allocation7], 0 }
   0x2   :  { %11 = vsyncpa [#allocation7 + $0x1], 0 }
   0x3   :  { %12 = vsyncpa [#allocation5], 0  ;;  %s1724_s12 = smov 0   ;;  %s1726_s13 = smov 0  }
   0x4   :  { %s1728_s14 = smov 0   ;;  %s1730_s15 = smov 0  }
   0x5   :  { %s1732_s16 = smov 0   ;;  %s1734_s17 = smov 0  }
   0x6 LB: > { %s27_s18 = sadd.s32 1, %s1686_s16  ;;  %s63_s19 = sadd.s32 1, %s1678_s14  ;;  %s1690_s17 = sphi %s1734_s17, %s18_s17   ;;  %s1686_s16 = sphi %s1732_s16, %s1999_s16   ;;  %s1682_s15 = sphi %s1730_s15, %s1998_s15   ;;  %s1678_s14 = sphi %s1728_s14, %s1997_s14   ;;  %s1674_s13 = sphi %s1726_s13, %s1996_s13   ;;  %s1670_s12 = sphi %s1724_s12, %s1995_s12  }
   0x7   : > { %p28_p0 = scmp.ge.s32.totalorder %s27_s18, 2  ;;  %p70_p1 = scmp.ne.s32.totalorder %s1678_s14, %s1674_s13 }
   0x8   : > { %p71_p2 = scmp.eq.s32.totalorder %s1690_s17, 0  ;;  %p1301_p4 = scmp.lt.s32.totalorder %s1690_s17, 2 }
   0x9   : > { %s2001_s18 = smov (%p28_p0, %s27_s18), 0  ;;  %s169_s21 = sand.u32 1, %s1690_s17  }
   0xa   : > { %p72_p3 = por %p71_p2, %p70_p1  ;;  %s60_s20 = ssub.s32 %s1686_s16, %s2001_s18 }
   0xb   : > { %p61_p5 = scmp.eq.s32.totalorder %s60_s20, 0  ;;  %s171_s22 = sand.u32 1, %s1678_s14  }
   0xc   : > { %s1274_s23 = sshll.u32 %s1686_s16, 8  ;;  %s1155_s25 = sshll.u32 %s171_s22, 9 }
   0xd   : > { %s1768_s24 = scalar_select %p61_p5, %s1678_s14, %s63_s19  }
   0xe   : > { %s179_s28 = scalar_lea.hbm %s1988_s1, %s1274_s23  ;;  %p1775_p6 = pnand %p1301_p4, %p72_p3 }
   0xf   : > { %s173_s30 = scalar_lea.vmem [#allocation6], %s1155_s25  ;;  %s1779_s5 = scalar_lea.sflag [#allocation7], %s169_s21 }
  0x10   : > { %s180_s4 = sshll.u32 %s173_s30, 4  ;;  %p1528_p7 = pneg %p1775_p6  ;;  %s181_s4 = int_to_ptr.vmem [resolvable:$true] %s180_s4 }
  0x11   : > { %s1539_s6 = scalar_lea.vmem %s181_s4, 8192  ;;  %s1692_s7 = smov [#allocation6]  }
  0x12   : > { %p1540_p8 = scmp.ne.s32.totalorder %s181_s4, %s1539_s6  ;;  %s1544_s8 = sshll.u32 %s1692_s7, 4  ;;  %s1545_s8 = int_to_ptr.vmem [resolvable:$false] %s1544_s8 }
  0x13   : > { %s1546_s9 = scalar_lea.vmem %s1545_s8, 16384  ;;  %p1547_p11 = scmp.lt.s32.totalorder %s181_s4, %s1545_s8 }
  0x14   : > { %p1542_p9 = pnand %p1540_p8, %p1528_p7  ;;  %p1548_p12 = scmp.lt.s32.totalorder %s1546_s9, %s1539_s6 }
  0x16   : > { %p1543_p10 = pneg %p1542_p9  ;;  %p1549_p13 = por %p1548_p12, %p1547_p11 }
  0x18   : > { %p1550_p0 = pnand %p1549_p13, %p1543_p10 }
  0x1a   : > { %1553 = shalt.err (!%p1550_p0)
}
  0x1b   : > { %s1693_s10 = smov 512   ;;  %s1694_s11 = smov 256  }
  0x1c   : > { %s1695_s19 = smov 16   ;;  %s1790_s20 = sadd.s32 4294967295, %s1690_s17  }
  0x1d   : > { %1296 = dma.hbm_to_vmem [thread:$0]  (!%p1775_p6), %s179_s28, 8192, %s181_s4, %s1779_s5, %s1693_s10, %s1694_s11, %s1695_s19  }
  0x1e   : > { %p76_p1 = scmp.ne.s32.totalorder %s1674_s13, %s1670_s12  ;;  %p77_p2 = scmp.eq.s32.totalorder %s1790_s20, 0 }
  0x1f   : > { %p1152_p3 = scmp.ge.s32.totalorder %s1690_s17, 1  ;;  %p139_p4 = scmp.lt.s32.totalorder %s1690_s17, 3 }
  0x20   : > { %p1799_p5 = por %p77_p2, %p76_p1  ;;  %s1696_s25 = smov [#allocation3]  }
  0x21   : > { %p1803_p8 = pnand %p1152_p3, %p139_p4  ;;  %s155_s26 = sshll.u32 %s1696_s25, 4  ;;  %s156_s26 = int_to_ptr.vmem [resolvable:$true] %s155_s26 }
  0x22   : > { %s1158_s12 = sshll.u32 %s171_s22, 8  ;;  %s1276_s27 = sshll.u32 %s1686_s16, 12 }
  0x23   : > { %p1289_p9 = pneg %p1803_p8  ;;  %s1821_s6 = scalar_lea.hbm %s1989_s2, %s1276_s27 }
  0x24   : > { %s194_s7 = scalar_lea.vmem [#allocation8], %s1158_s12  ;;  %s1565_s9 = scalar_lea.vmem %s156_s26, 256 }
  0x25   : > { %p1814_p10 = pnand %p1289_p9, %p77_p2  ;;  %s202_s8 = sshll.u32 %s194_s7, 4  ;;  %s1823_s8 = int_to_ptr.vmem [resolvable:$true] %s202_s8 }
  0x26   : > { %p1566_p12 = scmp.ne.s32.totalorder %s156_s26, %s1565_s9  ;;  %p1573_p1 = scmp.lt.s32.totalorder %s156_s26, %s156_s26 }
  0x27   : > { %p1556_p11 = pneg %p1814_p10  ;;  %p1574_p3 = scmp.lt.s32.totalorder %s1565_s9, %s1565_s9 }
  0x29   : > { %p1568_p13 = pnand %p1566_p12, %p1556_p11  ;;  %p1575_p4 = por %p1574_p3, %p1573_p1 }
  0x2b   : > { %p1569_p0 = pneg %p1568_p13 }
  0x2d   : > { %p1576_p9 = pnand %p1575_p4, %p1569_p0 }
  0x2f   : > { %1579 = shalt.err (!%p1576_p9)
}
  0x30   : > { %s1697_s22 = smov 128   ;;  %s1698_s10 = smov 8  }
  0x31   : > { %1292 = dma.hbm_to_vmem [thread:$0]  (!%p1814_p10), %s1987_s0, 256, %s156_s26, [#allocation4], %s1697_s22, %s1697_s22, %s1698_s10  }
  0x32   : > { %s1593_s25 = scalar_lea.vmem %s1823_s8, 4096  ;;  %s1699_s12 = smov [#allocation8]  }
  0x33   : > { %p1594_p11 = scmp.ne.s32.totalorder %s1823_s8, %s1593_s25  ;;  %s1598_s27 = sshll.u32 %s1699_s12, 4  ;;  %s1599_s27 = int_to_ptr.vmem [resolvable:$false] %s1598_s27 }
  0x34   : > { %s1600_s30 = scalar_lea.vmem %s1599_s27, 8192  ;;  %p1601_p0 = scmp.lt.s32.totalorder %s1823_s8, %s1599_s27 }
  0x35   : > { %p1596_p12 = pnand %p1594_p11, %p1528_p7  ;;  %p1602_p1 = scmp.lt.s32.totalorder %s1600_s30, %s1593_s25 }
  0x37   : > { %p1597_p13 = pneg %p1596_p12  ;;  %p1603_p3 = por %p1602_p1, %p1601_p0 }
  0x39   : > { %p1604_p4 = pnand %p1603_p3, %p1597_p13 }
  0x3b   : > { %1607 = shalt.err (!%p1604_p4)
}
  0x3c   : > { %1299 = dma.hbm_to_vmem [thread:$0]  (!%p1775_p6), %s1821_s6, 4096, %s1823_s8, %s1779_s5, %s1697_s22, %s1697_s22, %s1698_s10  }
  0x3d   : > { %214 = sbr.rel (%p1803_p8) target bundleno = 610 (0x262), region = 32 }
  0x42   : > { %1657 = dma.done.wait (%p77_p2), [#allocation4], 256  }
  0x43   : > { %1659 = vsyncadd (%p77_p2), [#allocation4], 4294967040  ;;  %s220_s26 = sand.u32 1, %s1790_s20   ;;  %s222_s28 = sand.u32 1, %s1674_s13  }
  0x44   : > { %s1164_s4 = sshll.u32 %s222_s28, 9  ;;  %s221_s29 = scalar_lea.sflag [#allocation7], %s220_s26 }
  0x45   : > { %s1851_s7 = scalar_lea.vmem [#allocation6], %s1164_s4 }
  0x46   : > { %1661 = dma.done.wait (%p1799_p5), %s221_s29, 12288  }
  0x47   : > { %1663 = vsyncadd (%p1799_p5), %s221_s29, 4294955008  ;;  %s1165_s5 = sshll.u32 %s222_s28, 8  ;;  %p1166_p6 = scmp.ne.s32.totalorder %s1682_s15, 0 }
  0x48   : > { %s1857_s23 = scalar_lea.vmem [#allocation8], %s1165_s5 }
  0x49   : > { %263 = sbr.rel (%p1166_p6) target bundleno = 81 (0x51), region = 48 }
  0x4e   : > { %v1700_v0 = vmov 0.0  }
  0x4f   : > { %264 = vst [vmem:[#allocation2 + $0x10] sm:$0xff] %v1700_v0  ;;  %265 = vst [vmem:[#allocation2] sm:$0xff] %v1700_v0 }
  0x50   : > { %266 = vst [vmem:[#allocation2 + $0x18] sm:$0xff] %v1700_v0  ;;  %267 = vst [vmem:[#allocation2 + $0x8] sm:$0xff] %v1700_v0 }
  0x51 PF: > { %v1363_v1 = vld [vmem:[%s1851_s7 + $0xe4] ss:$16 sps:$4 sm:$0xff]   ;;  %v1365_v2 = vld [vmem:[%s1851_s7 + $0xe0] ss:$16 sps:$4 sm:$0xff]   ;;  %v1386_v9 = vld [vmem:[%s1851_s7 + $0xec] ss:$16 sps:$4 sm:$0xff]  }
  0x52   : > { %664 = vmatprep.subr.bf16.mxu0 %v1363_v1  ;;  %v1366_v3 = vld [vmem:[%s1851_s7 + $0xc4] ss:$16 sps:$4 sm:$0xff]   ;;  %v1368_v4 = vld [vmem:[%s1851_s7 + $0xc0] ss:$16 sps:$4 sm:$0xff]   ;;  %v1389_v10 = vld [vmem:[%s1851_s7 + $0xe8] ss:$16 sps:$4 sm:$0xff]   ;;  %707 = vmatprep.subr.bf16.mxu1 %v1386_v9 }
  0x53   : > { %665 = vmatpush1.bf16.msra.mxu0 %v1365_v2  ;;  %v1369_v5 = vld [vmem:[%s1851_s7 + $0xa4] ss:$16 sps:$4 sm:$0xff]   ;;  %v1371_v6 = vld [vmem:[%s1851_s7 + $0xa0] ss:$16 sps:$4 sm:$0xff]   ;;  %v1392_v12 = vld [vmem:[%s1851_s7 + $0xcc] ss:$16 sps:$4 sm:$0xff]   ;;  %708 = vmatpush1.bf16.msra.mxu1 %v1389_v10 }
  0x54   : > { %666 = vmatprep.subr.bf16.mxu0 %v1366_v3  ;;  %v1372_v7 = vld [vmem:[%s1851_s7 + $0x84] ss:$16 sps:$4 sm:$0xff]   ;;  %v1374_v8 = vld [vmem:[%s1851_s7 + $0x80] ss:$16 sps:$4 sm:$0xff]   ;;  %v1395_v13 = vld [vmem:[%s1851_s7 + $0xc8] ss:$16 sps:$4 sm:$0xff]   ;;  %709 = vmatprep.subr.bf16.mxu1 %v1392_v12 }
  0x55   : > { %v1375_v11 = vld [vmem:[%s1851_s7 + $0x64] ss:$16 sps:$4 sm:$0xff]   ;;  %v1377_v14 = vld [vmem:[%s1851_s7 + $0x60] ss:$16 sps:$4 sm:$0xff]   ;;  %v1398_v16 = vld [vmem:[%s1851_s7 + $0xac] ss:$16 sps:$4 sm:$0xff]  }
  0x56   : > { %v1378_v15 = vld [vmem:[%s1851_s7 + $0x44] ss:$16 sps:$4 sm:$0xff]   ;;  %v1401_v17 = vld [vmem:[%s1851_s7 + $0xa8] ss:$16 sps:$4 sm:$0xff]   ;;  %v1380_v18 = vld [vmem:[%s1851_s7 + $0x40] ss:$16 sps:$4 sm:$0xff]  }
  0x57   : > { %667 = vmatpush1.bf16.msra.mxu0 %v1368_v4  ;;  %710 = vmatpush1.bf16.msra.mxu1 %v1395_v13  ;;  %v1404_v19 = vld [vmem:[%s1851_s7 + $0x8c] ss:$16 sps:$4 sm:$0xff]   ;;  %v1381_v20 = vld [vmem:[%s1851_s7 + $0x24] ss:$16 sps:$4 sm:$0xff]   ;;  %v1383_v21 = vld [vmem:[%s1851_s7 + $0x20] ss:$16 sps:$4 sm:$0xff]  }
  0x58   : > { %668 = vmatprep.subr.bf16.mxu0 %v1369_v5  ;;  %711 = vmatprep.subr.bf16.mxu1 %v1398_v16  ;;  %v1407_v22 = vld [vmem:[%s1851_s7 + $0x88] ss:$16 sps:$4 sm:$0xff]   ;;  %v1410_v23 = vld [vmem:[%s1851_s7 + $0x6c] ss:$16 sps:$4 sm:$0xff]   ;;  %v1384_v24 = vld [vmem:[%s1851_s7 + $0x4] ss:$16 sps:$4 sm:$0xff]  }
  0x59   : > { %v1413_v25 = vld [vmem:[%s1851_s7 + $0x68] ss:$16 sps:$4 sm:$0xff]   ;;  %v1388_v26 = vld [vmem:[%s1851_s7] ss:$16 sps:$4 sm:$0xff]   ;;  %v1416_v27 = vld [vmem:[%s1851_s7 + $0x4c] ss:$16 sps:$4 sm:$0xff]  }
  0x5a   : > { %v1390_v28 = vld [vmem:[%s1851_s7 + $0x1e4] ss:$16 sps:$4 sm:$0xff]   ;;  %v1394_v29 = vld [vmem:[%s1851_s7 + $0x1e0] ss:$16 sps:$4 sm:$0xff]   ;;  %v1419_v30 = vld [vmem:[%s1851_s7 + $0x48] ss:$16 sps:$4 sm:$0xff]  }
  0x5b   : > { %669 = vmatpush1.bf16.msra.mxu0 %v1371_v6  ;;  %712 = vmatpush1.bf16.msra.mxu1 %v1401_v17  ;;  %v1422_v31 = vld [vmem:[%s1851_s7 + $0x2c] ss:$16 sps:$4 sm:$0xff]   ;;  %v1396_v32 = vld [vmem:[%s1851_s7 + $0x1c4] ss:$16 sps:$4 sm:$0xff]   ;;  %v1425_v33 = vld [vmem:[%s1851_s7 + $0x28] ss:$16 sps:$4 sm:$0xff]  }
  0x5c   : > { %670 = vmatprep.subr.bf16.mxu0 %v1372_v7  ;;  %713 = vmatprep.subr.bf16.mxu1 %v1404_v19  ;;  %v1440_v34 = vld [vmem:[#allocation3 + $0x4] ss:$8 sps:$4 sm:$0xff]   ;;  %v1400_v35 = vld [vmem:[%s1851_s7 + $0x1c0] ss:$16 sps:$4 sm:$0xff]   ;;  %v1431_v38 = vld [vmem:[%s1851_s7 + $0x8] ss:$16 sps:$4 sm:$0xff]  }
  0x5d   : > { %v1428_v36 = vld [vmem:[%s1851_s7 + $0xc] ss:$16 sps:$4 sm:$0xff]   ;;  %v1402_v37 = vld [vmem:[%s1851_s7 + $0x1a4] ss:$16 sps:$4 sm:$0xff]   ;;  %696 = vmatprep.mubr.bf16.mxu0 %v1440_v34  ;;  %739 = vmatprep.mubr.bf16.mxu1 %v1440_v34  ;;  %v1406_v39 = vld [vmem:[%s1851_s7 + $0x1a0] ss:$16 sps:$4 sm:$0xff]  }
  0x5e   : > { %v1434_v40 = vld [vmem:[%s1851_s7 + $0x1ec] ss:$16 sps:$4 sm:$0xff]   ;;  %v1408_v41 = vld [vmem:[%s1851_s7 + $0x184] ss:$16 sps:$4 sm:$0xff]   ;;  %v1437_v42 = vld [vmem:[%s1851_s7 + $0x1e8] ss:$16 sps:$4 sm:$0xff]  }
  0x5f   : > { %671 = vmatpush1.bf16.msra.mxu0 %v1374_v8  ;;  %714 = vmatpush1.bf16.msra.mxu1 %v1407_v22  ;;  %v1412_v43 = vld [vmem:[%s1851_s7 + $0x180] ss:$16 sps:$4 sm:$0xff]   ;;  %v1441_v44 = vld [vmem:[%s1851_s7 + $0x1cc] ss:$16 sps:$4 sm:$0xff]   ;;  %v1414_v45 = vld [vmem:[%s1851_s7 + $0x164] ss:$16 sps:$4 sm:$0xff]  }
  0x60   : > { %672 = vmatprep.subr.bf16.mxu0 %v1375_v11  ;;  %715 = vmatprep.subr.bf16.mxu1 %v1410_v23  ;;  %v1443_v46 = vld [vmem:[%s1851_s7 + $0x1c8] ss:$16 sps:$4 sm:$0xff]   ;;  %v1418_v47 = vld [vmem:[%s1851_s7 + $0x160] ss:$16 sps:$4 sm:$0xff]   ;;  %v1444_v48 = vld [vmem:[%s1851_s7 + $0x1ac] ss:$16 sps:$4 sm:$0xff]  }
  0x61   : > { %v1420_v49 = vld [vmem:[%s1851_s7 + $0x144] ss:$16 sps:$4 sm:$0xff]   ;;  %v1424_v50 = vld [vmem:[%s1851_s7 + $0x140] ss:$16 sps:$4 sm:$0xff]   ;;  %v1446_v52 = vld [vmem:[%s1851_s7 + $0x1a8] ss:$16 sps:$4 sm:$0xff]  }
  0x62   : > { %v1426_v51 = vld [vmem:[%s1851_s7 + $0x124] ss:$16 sps:$4 sm:$0xff]   ;;  %v1447_v53 = vld [vmem:[%s1851_s7 + $0x18c] ss:$16 sps:$4 sm:$0xff]   ;;  %v1449_v54 = vld [vmem:[%s1851_s7 + $0x188] ss:$16 sps:$4 sm:$0xff]  }
  0x63   : > { %673 = vmatpush1.bf16.msra.mxu0 %v1377_v14  ;;  %716 = vmatpush1.bf16.msra.mxu1 %v1413_v25  ;;  %v1430_v55 = vld [vmem:[%s1851_s7 + $0x120] ss:$16 sps:$4 sm:$0xff]   ;;  %v1450_v56 = vld [vmem:[%s1851_s7 + $0x16c] ss:$16 sps:$4 sm:$0xff]   ;;  %v1432_v57 = vld [vmem:[%s1851_s7 + $0x104] ss:$16 sps:$4 sm:$0xff]  }
  0x64   : > { %674 = vmatprep.subr.bf16.mxu0 %v1378_v15  ;;  %717 = vmatprep.subr.bf16.mxu1 %v1416_v27  ;;  %v1452_v58 = vld [vmem:[%s1851_s7 + $0x168] ss:$16 sps:$4 sm:$0xff]   ;;  %v1436_v59 = vld [vmem:[%s1851_s7 + $0x100] ss:$16 sps:$4 sm:$0xff]   ;;  %v1453_v60 = vld [vmem:[%s1851_s7 + $0x14c] ss:$16 sps:$4 sm:$0xff]  }
  0x65   : > { %v1464_v61 = vld [vmem:[%s1857_s23 + $0x74] ss:$8 sps:$4 sm:$0xff]   ;;  %v1438_v62 = vld [vmem:[#allocation3] ss:$8 sps:$4 sm:$0xff]   ;;  %v1467_v2 = vld [vmem:[%s1857_s23 + $0x64] ss:$8 sps:$4 sm:$0xff]  }
  0x66   : > { %v1455_v63 = vld [vmem:[%s1851_s7 + $0x148] ss:$16 sps:$4 sm:$0xff]   ;;  %v1456_v0 = vld [vmem:[%s1851_s7 + $0x12c] ss:$16 sps:$4 sm:$0xff]   ;;  %p1269_p7 = scmp.ne.s32.totalorder %s1682_s15, 1 }
  0x67   : > { %675 = vmatpush1.bf16.msra.mxu0 %v1380_v18  ;;  %718 = vmatpush1.bf16.msra.mxu1 %v1419_v30  ;;  %v1462_v1 = vld [vmem:[%s1857_s23 + $0x70] ss:$8 sps:$4 sm:$0xff]   ;;  %v1459_v4 = vld [vmem:[%s1851_s7 + $0x10c] ss:$16 sps:$4 sm:$0xff]   ;;  %v1465_v5 = vld [vmem:[%s1857_s23 + $0x60] ss:$8 sps:$4 sm:$0xff]  }
  0x68   : > { %676 = vmatprep.subr.bf16.mxu0 %v1381_v20  ;;  %719 = vmatprep.subr.bf16.mxu1 %v1422_v31  ;;  %v1458_v3 = vld [vmem:[%s1851_s7 + $0x128] ss:$16 sps:$4 sm:$0xff]   ;;  %v1470_v6 = vld [vmem:[%s1857_s23 + $0x54] ss:$8 sps:$4 sm:$0xff]   ;;  %v1473_v9 = vld [vmem:[%s1857_s23 + $0x44] ss:$8 sps:$4 sm:$0xff]  }
  0x69   : > { %v1461_v7 = vld [vmem:[%s1851_s7 + $0x108] ss:$16 sps:$4 sm:$0xff]   ;;  %v1476_v11 = vld [vmem:[%s1857_s23 + $0x34] ss:$8 sps:$4 sm:$0xff]   ;;  %v1479_v13 = vld [vmem:[%s1857_s23 + $0x24] ss:$8 sps:$4 sm:$0xff]  }
  0x6a   : > { %v1468_v8 = vld [vmem:[%s1857_s23 + $0x50] ss:$8 sps:$4 sm:$0xff]   ;;  %v1471_v10 = vld [vmem:[%s1857_s23 + $0x40] ss:$8 sps:$4 sm:$0xff]   ;;  %v1482_v15 = vld [vmem:[%s1857_s23 + $0x14] ss:$8 sps:$4 sm:$0xff]  }
  0x6b   : > { %677 = vmatpush1.bf16.msra.mxu0 %v1383_v21  ;;  %720 = vmatpush1.bf16.msra.mxu1 %v1425_v33  ;;  %v1474_v12 = vld [vmem:[%s1857_s23 + $0x30] ss:$8 sps:$4 sm:$0xff]   ;;  %v1477_v14 = vld [vmem:[%s1857_s23 + $0x20] ss:$8 sps:$4 sm:$0xff]   ;;  %v1485_v17 = vld [vmem:[%s1857_s23 + $0x4] ss:$8 sps:$4 sm:$0xff]  }
  0x6c   : > { %678 = vmatprep.subr.bf16.mxu0 %v1384_v24  ;;  %721 = vmatprep.subr.bf16.mxu1 %v1428_v36  ;;  %v1480_v16 = vld [vmem:[%s1857_s23 + $0x10] ss:$8 sps:$4 sm:$0xff]   ;;  %v1483_v18 = vld [vmem:[%s1857_s23] ss:$8 sps:$4 sm:$0xff]   ;;  %v1488_v19 = vld [vmem:[%s1857_s23 + $0xf4] ss:$8 sps:$4 sm:$0xff]  }
  0x6d   : > { %v1486_v20 = vld [vmem:[%s1857_s23 + $0xf0] ss:$8 sps:$4 sm:$0xff]   ;;  %v1491_v21 = vld [vmem:[%s1857_s23 + $0xe4] ss:$8 sps:$4 sm:$0xff]   ;;  %v1489_v22 = vld [vmem:[%s1857_s23 + $0xe0] ss:$8 sps:$4 sm:$0xff]  }
  0x6e   : > { %v1494_v23 = vld [vmem:[%s1857_s23 + $0xd4] ss:$8 sps:$4 sm:$0xff]   ;;  %v1492_v24 = vld [vmem:[%s1857_s23 + $0xd0] ss:$8 sps:$4 sm:$0xff]   ;;  %v1497_v25 = vld [vmem:[%s1857_s23 + $0xc4] ss:$8 sps:$4 sm:$0xff]  }
  0x6f   : > { %679 = vmatpush1.bf16.msra.mxu0 %v1388_v26  ;;  %722 = vmatpush1.bf16.msra.mxu1 %v1431_v38  ;;  %v1495_v26 = vld [vmem:[%s1857_s23 + $0xc0] ss:$8 sps:$4 sm:$0xff]   ;;  %v1500_v27 = vld [vmem:[%s1857_s23 + $0xb4] ss:$8 sps:$4 sm:$0xff]   ;;  %v1509_v33 = vld [vmem:[%s1857_s23 + $0x84] ss:$8 sps:$4 sm:$0xff]  }
  0x70   : > { %680 = vmatprep.subr.bf16.mxu0 %v1390_v28  ;;  %723 = vmatprep.subr.bf16.mxu1 %v1434_v40  ;;  %v1498_v28 = vld [vmem:[%s1857_s23 + $0xb0] ss:$8 sps:$4 sm:$0xff]   ;;  %v1501_v30 = vld [vmem:[%s1857_s23 + $0xa0] ss:$8 sps:$4 sm:$0xff]   ;;  %v1506_v31 = vld [vmem:[%s1857_s23 + $0x94] ss:$8 sps:$4 sm:$0xff]  }
  0x71   : > { %v1507_v34 = vld [vmem:[%s1857_s23 + $0x80] ss:$8 sps:$4 sm:$0xff]  }
  0x73   : > { %681 = vmatpush2.bf16.msra.mxu0 %v1394_v29  ;;  %724 = vmatpush2.bf16.msra.mxu1 %v1437_v42  ;;  %v1503_v29 = vld [vmem:[%s1857_s23 + $0xa4] ss:$8 sps:$4 sm:$0xff]  }
  0x74   : > { %682 = vmatprep.subr.bf16.mxu0 %v1396_v32  ;;  %725 = vmatprep.subr.bf16.mxu1 %v1441_v44  ;;  %v1504_v32 = vld [vmem:[%s1857_s23 + $0x90] ss:$8 sps:$4 sm:$0xff]  }
  0x77   : > { %683 = vmatpush2.bf16.msra.mxu0 %v1400_v35  ;;  %726 = vmatpush2.bf16.msra.mxu1 %v1443_v46 }
  0x78   : > { %684 = vmatprep.subr.bf16.mxu0 %v1402_v37  ;;  %727 = vmatprep.subr.bf16.mxu1 %v1444_v48 }
  0x7b   : > { %685 = vmatpush2.bf16.msra.mxu0 %v1406_v39  ;;  %728 = vmatpush2.bf16.msra.mxu1 %v1446_v52 }
  0x7c   : > { %686 = vmatprep.subr.bf16.mxu0 %v1408_v41  ;;  %729 = vmatprep.subr.bf16.mxu1 %v1447_v53 }
  0x7f   : > { %687 = vmatpush2.bf16.msra.mxu0 %v1412_v43  ;;  %730 = vmatpush2.bf16.msra.mxu1 %v1449_v54 }
  0x80   : > { %688 = vmatprep.subr.bf16.mxu0 %v1414_v45  ;;  %731 = vmatprep.subr.bf16.mxu1 %v1450_v56 }
  0x83   : > { %689 = vmatpush2.bf16.msra.mxu0 %v1418_v47  ;;  %732 = vmatpush2.bf16.msra.mxu1 %v1452_v58 }
  0x84   : > { %690 = vmatprep.subr.bf16.mxu0 %v1420_v49  ;;  %733 = vmatprep.subr.bf16.mxu1 %v1453_v60 }
  0x87   : > { %691 = vmatpush2.bf16.msra.mxu0 %v1424_v50  ;;  %734 = vmatpush2.bf16.msra.mxu1 %v1455_v63 }
  0x88   : > { %692 = vmatprep.subr.bf16.mxu0 %v1426_v51  ;;  %735 = vmatprep.subr.bf16.mxu1 %v1456_v0 }
  0x8b   : > { %693 = vmatpush2.bf16.msra.mxu0 %v1430_v55  ;;  %736 = vmatpush2.bf16.msra.mxu1 %v1458_v3 }
  0x8c   : > { %694 = vmatprep.subr.bf16.mxu0 %v1432_v57  ;;  %737 = vmatprep.subr.bf16.mxu1 %v1459_v4 }
  0x8f   : > { %695 = vmatpush2.bf16.msra.mxu0 %v1436_v59  ;;  %738 = vmatpush2.bf16.msra.mxu1 %v1461_v7  ;;  %v783_v7 = vld [vmem:[#allocation2] sm:$0xff] }
  0x90   : > { %980 = vmatprep.subr.bf16.mxu0 %v1464_v61 }
  0x92   : > { %697 = vmatmul.mubr.bf16.vlgmr.msra.gmra.mxu0 %v1438_v62  ;;  %740 = vmatmul.mubr.bf16.vlgmr.msra.gmra.mxu1 %v1438_v62 }
  0x93   : > { %981 = vmatpush1.bf16.msra.mxu0 %v1462_v1 }
  0x94   : > { %982 = vmatprep.subr.bf16.mxu0 %v1467_v2 }
  0x97   : > { %983 = vmatpush1.bf16.msra.mxu0 %v1465_v5  ;;  %v782_v5 = vld [vmem:[#allocation2 + $0x10] sm:$0xff] }
  0x98   : > { %984 = vmatprep.subr.bf16.mxu0 %v1470_v6 }
  0x9b   : > { %985 = vmatpush1.bf16.msra.mxu0 %v1468_v8 }
  0x9c   : > { %986 = vmatprep.subr.bf16.mxu0 %v1473_v9 }
  0x9f   : > { %987 = vmatpush1.bf16.msra.mxu0 %v1471_v10  ;;  %v784_v10 = vld [vmem:[#allocation2 + $0x18] sm:$0xff] }
  0xa0   : > { %988 = vmatprep.subr.bf16.mxu0 %v1476_v11 }
  0xa3   : > { %989 = vmatpush1.bf16.msra.mxu0 %v1474_v12 }
  0xa4   : > { %990 = vmatprep.subr.bf16.mxu0 %v1479_v13  ;;  %v785_v13 = vld [vmem:[#allocation2 + $0x8] sm:$0xff] }
  0xa7   : > { %991 = vmatpush1.bf16.msra.mxu0 %v1477_v14 }
  0xa8   : > { %992 = vmatprep.subr.bf16.mxu0 %v1482_v15 }
  0xab   : > { %993 = vmatpush1.bf16.msra.mxu0 %v1480_v16 }
  0xac   : > { %994 = vmatprep.subr.bf16.mxu0 %v1485_v17 }
  0xaf   : > { %995 = vmatpush1.bf16.msra.mxu0 %v1483_v18 }
  0xb0   : > { %996 = vmatprep.subr.bf16.mxu0 %v1488_v19 }
  0xb3   : > { %997 = vmatpush2.bf16.msra.mxu0 %v1486_v20 }
  0xb4   : > { %998 = vmatprep.subr.bf16.mxu0 %v1491_v21 }
  0xb7   : > { %999 = vmatpush2.bf16.msra.mxu0 %v1489_v22 }
  0xb8   : > { %1000 = vmatprep.subr.bf16.mxu0 %v1494_v23 }
  0xbb   : > { %1001 = vmatpush2.bf16.msra.mxu0 %v1492_v24 }
  0xbc   : > { %1002 = vmatprep.subr.bf16.mxu0 %v1497_v25 }
  0xbf   : > { %1003 = vmatpush2.bf16.msra.mxu0 %v1495_v26 }
  0xc0   : > { %1004 = vmatprep.subr.bf16.mxu0 %v1500_v27 }
  0xc3   : > { %1005 = vmatpush2.bf16.msra.mxu0 %v1498_v28 }
  0xc4   : > { %1006 = vmatprep.subr.bf16.mxu0 %v1503_v29 }
  0xc7   : > { %1007 = vmatpush2.bf16.msra.mxu0 %v1501_v30 }
  0xc8   : > { %1008 = vmatprep.subr.bf16.mxu0 %v1506_v31 }
  0xcb   : > { %1009 = vmatpush2.bf16.msra.mxu0 %v1504_v32 }
  0xcc   : > { %1010 = vmatprep.subr.bf16.mxu0 %v1509_v33 }
  0xcf   : > { %1011 = vmatpush2.bf16.msra.mxu0 %v1507_v34 }
 0x152   : > { %v698_v35 = vpop.f32.mrf.mxu0  ;;  %v741_v51 = vpop.f32.mrf.mxu1 }
 0x153   : > { %v1233_v36 = vmul.f32 -1.442695, %v698_v35 }
 0x154   : > { %v700_v37 = vpop.f32.mrf.mxu0  ;;  %v743_v52 = vpop.f32.mrf.mxu1 }
 0x155   : > { %1510 = vpow2.f32 %v1233_v36  ;;  %v1234_v38 = vmul.f32 -1.442695, %v700_v37 }
 0x156   : > { %v702_v39 = vpop.f32.mrf.mxu0  ;;  %v745_v56 = vpop.f32.mrf.mxu1 }
 0x157   : > { %1512 = vpow2.f32 %v1234_v38  ;;  %v1235_v40 = vmul.f32 -1.442695, %v702_v39 }
 0x158   : > { %v704_v41 = vpop.f32.mrf.mxu0  ;;  %v747_v63 = vpop.f32.mrf.mxu1 }
 0x159   : > { %1514 = vpow2.f32 %v1235_v40  ;;  %v1236_v42 = vmul.f32 -1.442695, %v704_v41 }
 0x15b   : > { %1516 = vpow2.f32 %v1236_v42 }
 0x162   : > { %v1511_v43 = vpop.eup %1510 }
 0x163   : > { %v762_v45 = vadd.f32 1.0, %v1511_v43 }
 0x164   : > { %v1513_v44 = vpop.eup %1512 }
 0x165   : > { %v763_v46 = vadd.f32 1.0, %v1513_v44 }
 0x166   : > { %v1515_v47 = vpop.eup %1514 }
 0x167   : > { %1518 = vrcp.f32 %v763_v46  ;;  %v764_v48 = vadd.f32 1.0, %v1515_v47 }
 0x168   : > { %v1517_v49 = vpop.eup %1516  ;;  %1520 = vrcp.f32 %v762_v45 }
 0x169   : > { %1522 = vrcp.f32 %v764_v48  ;;  %v765_v50 = vadd.f32 1.0, %v1517_v49 }
 0x16b   : > { %1524 = vrcp.f32 %v765_v50 }
 0x174   : > { %v1519_v53 = vpop.eup %1518 }
 0x175   : > { %v1521_v54 = vpop.eup %1520  ;;  %v775_v57 = vmul.f32 %v1519_v53, %v700_v37 }
 0x176   : > { %v1523_v55 = vpop.eup %1522  ;;  %v774_v60 = vmul.f32 %v1521_v54, %v698_v35 }
 0x177   : > { %v776_v58 = vmul.f32 %v1523_v55, %v702_v39  ;;  %v779_v0 = vmul.f32 %v775_v57, %v743_v52 }
 0x178   : > { %v1525_v59 = vpop.eup %1524  ;;  %v778_v2 = vmul.f32 %v774_v60, %v741_v51 }
 0x179   : > { %v777_v61 = vmul.f32 %v1525_v59, %v704_v41  ;;  %v780_v62 = vmul.f32 %v776_v58, %v745_v56 }
 0x17b   : > { %v781_v1 = vmul.f32 %v777_v61, %v747_v63  ;;  %v786_v4 = vpack.c.bf16 %v780_v62, %v778_v2 }
 0x17d   : > { %v787_v3 = vpack.c.bf16 %v781_v1, %v779_v0 }
 0x17f   : > { %1012 = vmatprep.mubr.bf16.mxu0 %v787_v3 }
 0x180   : > { %1013 = vmatmul.mubr.bf16.vlgmr.msra.gmra.mxu0 %v786_v4 }
 0x240   : > { %v1014_v6 = vpop.f32.mrf.mxu0 }
 0x241   : > { %v1023_v8 = vadd.f32 %v1014_v6, %v782_v5 }
 0x242   : > { %v1016_v9 = vpop.f32.mrf.mxu0 }
 0x243   : > { %1027 = vst [vmem:[#allocation2 + $0x10] sm:$0xff] %v1023_v8  ;;  %v1024_v11 = vadd.f32 %v1016_v9, %v783_v7 }
 0x244   : > { %v1018_v12 = vpop.f32.mrf.mxu0 }
 0x245   : > { %1028 = vst [vmem:[#allocation2] sm:$0xff] %v1024_v11  ;;  %v1025_v14 = vadd.f32 %v1018_v12, %v784_v10  ;;  %1034 = sbr.rel (%p1269_p7) target bundleno = 594 (0x252), region = 52 }
 0x246   : > { %v1020_v15 = vpop.f32.mrf.mxu0 }
 0x247   : > { %1029 = vst [vmem:[#allocation2 + $0x18] sm:$0xff] %v1025_v14  ;;  %v1026_v16 = vadd.f32 %v1020_v15, %v785_v13 }
 0x249   : > { %1030 = vst [vmem:[#allocation2 + $0x8] sm:$0xff] %v1026_v16 }
 0x24a   : > { %v1035_v17 = vld [vmem:[#allocation2 + $0x10] sm:$0xff] }
 0x24b   : > { %1039 = vst [vmem:[#allocation9] sm:$0xff] %v1035_v17 }
 0x24c   : > { %v1036_v18 = vld [vmem:[#allocation2] sm:$0xff] }
 0x24d   : > { %1040 = vst [vmem:[#allocation9 + $0x8] sm:$0xff] %v1036_v18 }
 0x24e   : > { %v1037_v19 = vld [vmem:[#allocation2 + $0x18] sm:$0xff] }
 0x24f   : > { %1041 = vst [vmem:[#allocation9 + $0x10] sm:$0xff] %v1037_v19 }
 0x250   : > { %v1038_v20 = vld [vmem:[#allocation2 + $0x8] sm:$0xff] }
 0x251   : > { %1042 = vst [vmem:[#allocation9 + $0x18] sm:$0xff] %v1038_v20 }
 0x252 PF: > { %p1303_p2 = scmp.eq.s32.totalorder %s1790_s20, 1  ;;  %s1701_s21 = smov [#allocation9]  }
 0x253   : > { %s1053_s6 = sshll.u32 %s1701_s21, 4  ;;  %s1054_s6 = int_to_ptr.vmem [resolvable:$true] %s1053_s6 }
 0x254   : > { %s1608_s8 = scalar_lea.vmem %s1054_s6, 512  ;;  %p1615_p9 = scmp.lt.s32.totalorder %s1054_s6, %s1054_s6 }
 0x255   : > { %p1609_p5 = scmp.ne.s32.totalorder %s1054_s6, %s1608_s8  ;;  %p1616_p11 = scmp.lt.s32.totalorder %s1608_s8, %s1608_s8 }
 0x257   : > { %p1610_p8 = pnand %p1609_p5, %p1303_p2  ;;  %p1617_p12 = por %p1616_p11, %p1615_p9 }
 0x259   : > { %p1611_p10 = pneg %p1610_p8 }
 0x25b   : > { %p1618_p13 = pnand %p1617_p12, %p1611_p10 }
 0x25d   : > { %1621 = shalt.err (!%p1618_p13)
}
 0x25e   : > { %s1702_s15 = smov 256   ;;  %s1703_s9 = smov 16  }
 0x25f   : > { %1286 = dma.vmem_to_hbm [thread:$0]  (%p1303_p2), %s1054_s6, 512, %s1990_s3, [#allocation5], %s1702_s15, %s1702_s15, %s1703_s9  }
 0x260   : > { %1665 = dma.done.wait (%p1303_p2), [#allocation5], 512  }
 0x261   : > { %1667 = vsyncadd (%p1303_p2), [#allocation5], 4294966784 }
 0x262 PF: > { %s18_s17 = sadd.s32 1, %s1690_s17   ;;  %s1995_s12 = smov %s1674_s13 }
 0x263   : > { %p15_p0 = scmp.ge.s32.totalorder %s18_s17, 4   ;;  %s1996_s13 = smov %s1678_s14 }
 0x264   : > { %s1997_s14 = smov %s1768_s24  ;;  %s1998_s15 = smov %s1686_s16 }
 0x265   : > { %s1999_s16 = smov %s2001_s18  ;;  %17 = sbr.rel (!%p15_p0) target bundleno = 6 (0x6), region = 95 }
 0x26a   :  { %1069 = vsyncpa [#allocation4], 1 }
 0x26b   :  { %1071 = vsyncpa [#allocation4 + $0x1], 1 }
 0x26c   :  { %1072 = vsyncpa [#allocation7], 1 }
 0x26d   :  { %1074 = vsyncpa [#allocation7 + $0x1], 1 }
 0x26e   :  { %1075 = vsyncpa [#allocation5], 1 }
 0x26f   :  { %1077 = vsyncpa [#allocation5 + $0x1], 1 }

</bundles_post_ra>
